<compile_context>
chip_gen: v6e
topology: v6e:2x2x1
jax: 0.10.0
libtpu: 0.0.40
codegen_flags: <defaults>
</compile_context>

<pallas_src>
import jax
import jax.numpy as jnp
from jax.experimental import pallas as pl
from jax.experimental.pallas import tpu as pltpu


# ---------------------------------------------------------------------------
# neighbor-shift helpers (operate on (B, N) values with N on the lane axis)
# ---------------------------------------------------------------------------
def _shift_down(x, fill):
    """prev[..., i] = x[..., i-1]; prev[..., 0] = fill."""
    n = x.shape[-1]
    if n % 128 == 0:
        # lane-aligned: one XLU rotate + boundary select
        lane = jax.lax.broadcasted_iota(jnp.int32, x.shape, dimension=x.ndim - 1)
        return jnp.where(lane == 0, fill, pltpu.roll(x, shift=1, axis=-1))
    pad = jnp.full(x.shape[:-1] + (1,), fill, x.dtype)
    return jnp.concatenate([pad, x[..., :-1]], axis=-1)


def _shift_up(x, fill):
    """nxt[..., i] = x[..., i+1]; nxt[..., N-1] = fill."""
    n = x.shape[-1]
    if n % 128 == 0:
        lane = jax.lax.broadcasted_iota(jnp.int32, x.shape, dimension=x.ndim - 1)
        return jnp.where(lane == n - 1, fill, pltpu.roll(x, shift=n - 1, axis=-1))
    pad = jnp.full(x.shape[:-1] + (1,), fill, x.dtype)
    return jnp.concatenate([x[..., 1:], pad], axis=-1)


# ---------------------------------------------------------------------------
# kernel
# ---------------------------------------------------------------------------
def _pos_feat_kernel(size_ref, box_ref, out_ref):
    # size_ref: VMEM (B, 2) f32, columns = (H, W)
    # box_ref : VMEM (B, 4, N) f32, rows = (x1, y1, x2, y2), N on lanes
    # out_ref : VMEM (B, 8, N) f32
    sizes = size_ref[...]                        # (B, 2)
    H = sizes[:, 0:1]                            # (B, 1)
    W = sizes[:, 1:2]                            # (B, 1)
    inv_h_img = 1.0 / H                          # tiny per-image reciprocals;
    inv_w_img = 1.0 / W                          # all N-length divides -> muls

    box = box_ref[...]                           # (B, 4, N)
    bx1 = box[:, 0, :]                           # (B, N) full-lane rows
    by1 = box[:, 1, :]
    bx2 = box[:, 2, :]
    by2 = box[:, 3, :]

    x1 = bx1 * inv_w_img
    y1 = by1 * inv_h_img
    x2 = bx2 * inv_w_img
    y2 = by2 * inv_h_img

    w = bx2 - bx1
    h = by2 - by1
    inv_w_avg = 1.0 / jnp.mean(w, axis=-1, keepdims=True)   # (B, 1)
    inv_h_avg = 1.0 / jnp.mean(h, axis=-1, keepdims=True)   # (B, 1)
    w_rel = w * inv_w_avg
    h_rel = h * inv_h_avg

    prev_y = _shift_down(by1, 0.0)               # previous line's raw y1 (0 at row 0)
    next_y = _shift_up(by1, 0.0)                 # next line's raw y1 (0 at row N-1)

    dy = (by1 - prev_y) * inv_h_img
    dy = jnp.where(dy < -0.2, y1, dy)            # new column -> restart at y1
    dyn = (next_y - by1) * inv_h_img
    dyn = jnp.where(dyn < -0.2, 1.0 - y1, dyn)   # next line starts a new column

    scale = H * inv_h_avg                        # (B, 1): H / h_avg
    feat = jnp.stack(
        [x1, y1, x2, y2, w_rel, h_rel, dy * scale, dyn * scale], axis=1
    )                                            # (B, 8, N)
    out_ref[...] = feat


# ---------------------------------------------------------------------------
# wrappers
# ---------------------------------------------------------------------------
def pos_feat_batched(boxes, img_sizes):
    """boxes: [B, N, 4] (x1,y1,x2,y2); img_sizes: [B, 2] (H, W) -> [B, N, 8]."""
    boxes = boxes.astype(jnp.float32)
    img_sizes = img_sizes.astype(jnp.float32)
    B, N, _ = boxes.shape
    boxes_t = jnp.transpose(boxes, (0, 2, 1))    # [B, 4, N]: layout plumbing only
    out_t = pl.pallas_call(
        _pos_feat_kernel,
        out_shape=jax.ShapeDtypeStruct((B, 8, N), jnp.float32),
        in_specs=[
            pl.BlockSpec(memory_space=pltpu.MemorySpace.VMEM),   # (H, W) table
            pl.BlockSpec(memory_space=pltpu.MemorySpace.VMEM),   # boxes [B,4,N]
        ],
        out_specs=pl.BlockSpec(memory_space=pltpu.MemorySpace.VMEM),
    )(img_sizes, boxes_t)
    # TODO(synk): for very large B*N (v7x has only 64 MiB VMEM) add a grid over
    # B / N tiles, carrying the boundary y1 row across N tiles; unnecessary here.
    return jnp.transpose(out_t, (0, 2, 1))       # [B, N, 8]


def pos_feat(lines_box, img_sizes):
    """API parity with PosFeat.forward (list-in / list-out).

    Hot-path callers should use pos_feat_batched and keep the batched array on
    device; this wrapper's per-image split forces host-side dispatch per image.
    Assumes all images share N (as in the demo)."""
    boxes = jnp.stack([jnp.asarray(b, jnp.float32) for b in lines_box], axis=0)
    sizes = jnp.stack([jnp.asarray(s, jnp.float32) for s in img_sizes], axis=0)
    out = pos_feat_batched(boxes, sizes)
    return [out[i] for i in range(out.shape[0])]


# ---------------------------------------------------------------------------
# pure-JAX reference (transliteration of the PyTorch forward, per image)
# ---------------------------------------------------------------------------
def _pos_feat_ref(box, hw):
    H, W = hw[0], hw[1]
    x1 = box[:, 0] / W
    y1 = box[:, 1] / H
    x2 = box[:, 2] / W
    y2 = box[:, 3] / H
    w_avg = jnp.mean(box[:, 2] - box[:, 0])
    h_avg = jnp.mean(box[:, 3] - box[:, 1])
    w_rel = (box[:, 2] - box[:, 0]) / w_avg
    h_rel = (box[:, 3] - box[:, 1]) / h_avg
    prev_y = jnp.concatenate([jnp.zeros((1,), box.dtype), box[:-1, 1]])
    dy = (box[:, 1] - prev_y) / H
    dy = jnp.where(dy < -0.2, y1, dy)
    next_y = jnp.concatenate([box[1:, 1], jnp.zeros((1,), box.dtype)])
    dyn = (next_y - box[:, 1]) / H
    dyn = jnp.where(dyn < -0.2, 1.0 - y1, dyn)
    return jnp.stack(
        [x1, y1, x2, y2, w_rel, h_rel, dy * H / h_avg, dyn * H / h_avg], axis=-1
    )


if __name__ == "__main__":
    B, N = 2, 8
    key = jax.random.PRNGKey(0)
    k1, k2, k3, k4 = jax.random.split(key, 4)
    x1 = jax.random.uniform(k1, (B, N, 1), minval=5.0, maxval=50.0)
    y1 = jax.random.uniform(k2, (B, N, 1), minval=5.0, maxval=200.0)
    w = jax.random.uniform(k3, (B, N, 1), minval=10.0, maxval=100.0)
    h = jax.random.uniform(k4, (B, N, 1), minval=5.0, maxval=20.0)
    boxes = jnp.concatenate([x1, y1, x1 + w, y1 + h], axis=-1).astype(jnp.float32)

    img_sizes = jnp.array([[256.0, 192.0], [300.0, 200.0]], dtype=jnp.float32)  # (H, W)

    out = jax.block_until_ready(pos_feat_batched(boxes, img_sizes))
    assert out.shape == (B, N, 8)

    # correctness check against the pure-JAX transliteration of the PyTorch code
    for i in range(B):
        ref = _pos_feat_ref(boxes[i], img_sizes[i])
        assert jnp.allclose(out[i], ref, rtol=1e-5, atol=1e-5), f"mismatch at image {i}"

    print("KERNEL_OK")
</pallas_src>

<mosaic_0001>
module attributes {stable_mosaic.version = 11 : i64} {
  func.func @_pos_feat_kernel(%arg0: memref<2x2xf32, #tpu.memory_space<vmem>>, %arg1: memref<2x4x8xf32, #tpu.memory_space<vmem>>, %arg2: memref<2x8x8xf32, #tpu.memory_space<vmem>>) attributes {dimension_semantics = [], scalar_prefetch = 0 : i64, scratch_operands = 0 : i64, tpu.core_type = #tpu.core_type<tc>} {
    %c0 = arith.constant 0 : index
    %c0_0 = arith.constant 0 : index
    %0 = vector.load %arg0[%c0, %c0_0] : memref<2x2xf32, #tpu.memory_space<vmem>>, vector<2x2xf32>
    %1 = vector.extract_strided_slice %0 {offsets = [0, 0], sizes = [2, 1], strides = [1, 1]} : vector<2x2xf32> to vector<2x1xf32>
    %2 = vector.extract_strided_slice %0 {offsets = [0, 1], sizes = [2, 1], strides = [1, 1]} : vector<2x2xf32> to vector<2x1xf32>
    %cst = arith.constant 1.000000e+00 : f32
    %3 = vector.broadcast %cst : f32 to vector<2x1xf32>
    %4 = arith.divf %3, %1 : vector<2x1xf32>
    %cst_1 = arith.constant 1.000000e+00 : f32
    %5 = vector.broadcast %cst_1 : f32 to vector<2x1xf32>
    %6 = arith.divf %5, %2 : vector<2x1xf32>
    %c0_2 = arith.constant 0 : index
    %c0_3 = arith.constant 0 : index
    %c0_4 = arith.constant 0 : index
    %7 = vector.load %arg1[%c0_2, %c0_3, %c0_4] : memref<2x4x8xf32, #tpu.memory_space<vmem>>, vector<2x4x8xf32>
    %8 = vector.extract_strided_slice %7 {offsets = [0, 0, 0], sizes = [2, 1, 8], strides = [1, 1, 1]} : vector<2x4x8xf32> to vector<2x1x8xf32>
    %9 = vector.shape_cast %8 : vector<2x1x8xf32> to vector<2x8xf32>
    %10 = vector.extract_strided_slice %7 {offsets = [0, 1, 0], sizes = [2, 1, 8], strides = [1, 1, 1]} : vector<2x4x8xf32> to vector<2x1x8xf32>
    %11 = vector.shape_cast %10 : vector<2x1x8xf32> to vector<2x8xf32>
    %12 = vector.extract_strided_slice %7 {offsets = [0, 2, 0], sizes = [2, 1, 8], strides = [1, 1, 1]} : vector<2x4x8xf32> to vector<2x1x8xf32>
    %13 = vector.shape_cast %12 : vector<2x1x8xf32> to vector<2x8xf32>
    %14 = vector.extract_strided_slice %7 {offsets = [0, 3, 0], sizes = [2, 1, 8], strides = [1, 1, 1]} : vector<2x4x8xf32> to vector<2x1x8xf32>
    %15 = vector.shape_cast %14 : vector<2x1x8xf32> to vector<2x8xf32>
    %16 = vector.broadcast %6 : vector<2x1xf32> to vector<2x8xf32>
    %17 = arith.mulf %9, %16 : vector<2x8xf32>
    %18 = vector.broadcast %4 : vector<2x1xf32> to vector<2x8xf32>
    %19 = arith.mulf %11, %18 : vector<2x8xf32>
    %20 = vector.broadcast %6 : vector<2x1xf32> to vector<2x8xf32>
    %21 = arith.mulf %13, %20 : vector<2x8xf32>
    %22 = vector.broadcast %4 : vector<2x1xf32> to vector<2x8xf32>
    %23 = arith.mulf %15, %22 : vector<2x8xf32>
    %24 = arith.subf %13, %9 : vector<2x8xf32>
    %25 = arith.subf %15, %11 : vector<2x8xf32>
    %cst_5 = arith.constant dense<0.000000e+00> : vector<2xf32>
    %26 = vector.multi_reduction <add>, %24, %cst_5 [1] : vector<2x8xf32> to vector<2xf32>
    %27 = vector.shape_cast %26 : vector<2xf32> to vector<2x1xf32>
    %cst_6 = arith.constant 8.000000e+00 : f32
    %28 = vector.broadcast %cst_6 : f32 to vector<2x1xf32>
    %29 = arith.divf %27, %28 : vector<2x1xf32>
    %cst_7 = arith.constant 1.000000e+00 : f32
    %30 = vector.broadcast %cst_7 : f32 to vector<2x1xf32>
    %31 = arith.divf %30, %29 : vector<2x1xf32>
    %cst_8 = arith.constant dense<0.000000e+00> : vector<2xf32>
    %32 = vector.multi_reduction <add>, %25, %cst_8 [1] : vector<2x8xf32> to vector<2xf32>
    %33 = vector.shape_cast %32 : vector<2xf32> to vector<2x1xf32>
    %cst_9 = arith.constant 8.000000e+00 : f32
    %34 = vector.broadcast %cst_9 : f32 to vector<2x1xf32>
    %35 = arith.divf %33, %34 : vector<2x1xf32>
    %cst_10 = arith.constant 1.000000e+00 : f32
    %36 = vector.broadcast %cst_10 : f32 to vector<2x1xf32>
    %37 = arith.divf %36, %35 : vector<2x1xf32>
    %38 = vector.broadcast %31 : vector<2x1xf32> to vector<2x8xf32>
    %39 = arith.mulf %24, %38 : vector<2x8xf32>
    %40 = vector.broadcast %37 : vector<2x1xf32> to vector<2x8xf32>
    %41 = arith.mulf %25, %40 : vector<2x8xf32>
    %cst_11 = arith.constant 0.000000e+00 : f32
    %42 = vector.broadcast %cst_11 : f32 to vector<2x1xf32>
    %43 = vector.extract_strided_slice %11 {offsets = [0, 0], sizes = [2, 7], strides = [1, 1]} : vector<2x8xf32> to vector<2x7xf32>
    %44 = tpu.concatenate %42, %43 in 1 : vector<2x1xf32>, vector<2x7xf32> -> vector<2x8xf32>
    %cst_12 = arith.constant 0.000000e+00 : f32
    %45 = vector.broadcast %cst_12 : f32 to vector<2x1xf32>
    %46 = vector.extract_strided_slice %11 {offsets = [0, 1], sizes = [2, 7], strides = [1, 1]} : vector<2x8xf32> to vector<2x7xf32>
    %47 = tpu.concatenate %46, %45 in 1 : vector<2x7xf32>, vector<2x1xf32> -> vector<2x8xf32>
    %48 = arith.subf %11, %44 : vector<2x8xf32>
    %49 = vector.broadcast %4 : vector<2x1xf32> to vector<2x8xf32>
    %50 = arith.mulf %48, %49 : vector<2x8xf32>
    %cst_13 = arith.constant -2.000000e-01 : f32
    %51 = vector.broadcast %cst_13 : f32 to vector<2x8xf32>
    %52 = arith.cmpf olt, %50, %51 : vector<2x8xf32>
    %53 = arith.select %52, %19, %50 : vector<2x8xi1>, vector<2x8xf32>
    %54 = arith.subf %47, %11 : vector<2x8xf32>
    %55 = vector.broadcast %4 : vector<2x1xf32> to vector<2x8xf32>
    %56 = arith.mulf %54, %55 : vector<2x8xf32>
    %cst_14 = arith.constant -2.000000e-01 : f32
    %57 = vector.broadcast %cst_14 : f32 to vector<2x8xf32>
    %58 = arith.cmpf olt, %56, %57 : vector<2x8xf32>
    %cst_15 = arith.constant 1.000000e+00 : f32
    %59 = vector.broadcast %cst_15 : f32 to vector<2x8xf32>
    %60 = arith.subf %59, %19 : vector<2x8xf32>
    %61 = arith.select %58, %60, %56 : vector<2x8xi1>, vector<2x8xf32>
    %62 = arith.mulf %1, %37 : vector<2x1xf32>
    %63 = vector.broadcast %62 : vector<2x1xf32> to vector<2x8xf32>
    %64 = arith.mulf %53, %63 : vector<2x8xf32>
    %65 = vector.broadcast %62 : vector<2x1xf32> to vector<2x8xf32>
    %66 = arith.mulf %61, %65 : vector<2x8xf32>
    %67 = vector.shape_cast %17 : vector<2x8xf32> to vector<2x1x8xf32>
    %68 = vector.shape_cast %19 : vector<2x8xf32> to vector<2x1x8xf32>
    %69 = vector.shape_cast %21 : vector<2x8xf32> to vector<2x1x8xf32>
    %70 = vector.shape_cast %23 : vector<2x8xf32> to vector<2x1x8xf32>
    %71 = vector.shape_cast %39 : vector<2x8xf32> to vector<2x1x8xf32>
    %72 = vector.shape_cast %41 : vector<2x8xf32> to vector<2x1x8xf32>
    %73 = vector.shape_cast %64 : vector<2x8xf32> to vector<2x1x8xf32>
    %74 = vector.shape_cast %66 : vector<2x8xf32> to vector<2x1x8xf32>
    %75 = tpu.concatenate %67, %68, %69, %70, %71, %72, %73, %74 in 1 : vector<2x1x8xf32>, vector<2x1x8xf32>, vector<2x1x8xf32>, vector<2x1x8xf32>, vector<2x1x8xf32>, vector<2x1x8xf32>, vector<2x1x8xf32>, vector<2x1x8xf32> -> vector<2x8x8xf32>
    %c0_16 = arith.constant 0 : index
    %c0_17 = arith.constant 0 : index
    %c0_18 = arith.constant 0 : index
    %76 = vector.load %arg2[%c0_16, %c0_17, %c0_18] : memref<2x8x8xf32, #tpu.memory_space<vmem>>, vector<2x8x8xf32>
    tpu.vector_store %arg2[%c0_16, %c0_17, %c0_18], %75 {strides = array<i32>} : memref<2x8x8xf32, #tpu.memory_space<vmem>>, vector<2x8x8xf32>,
    return
  }
}

</mosaic_0001>

<bundles_post_ra>
// kernel: tpu_custom_call.1
= control target key start
LH: loop header
LB: loop body
LE: loop exit
PB: predicated region body
PF: predicated region fallthrough
CT: control target
= control target key end

     0   :  { %7 = vsyncpa [#allocation3], 0  ;;  %s437_s0 = inlined_call_operand.hbm [shape: f32[2,2], index: 0, kind: input, shape index: {}]   ;;  %s438_s1 = inlined_call_operand.hbm [shape: f32[2,4,8], index: 1, kind: input, shape index: {}]   ;;  %s439_s2 = inlined_call_operand.hbm [shape: f32[2,8,8], index: 2, kind: output, shape index: {}]  }
   0x1   :  { %8 = vsyncpa [#allocation6], 0 }
   0x2   :  { %9 = vsyncpa [#allocation4], 0  ;;  %s350_s9 = smov [#allocation2]   ;;  %s351_s11 = smov [#allocation5]  }
   0x3   :  { %s16_s10 = sshll.u32 %s350_s9, 4  ;;  %s25_s12 = sshll.u32 %s351_s11, 4  ;;  %s17_s10 = int_to_ptr.vmem [resolvable:$true] %s16_s10  ;;  %s26_s12 = int_to_ptr.vmem [resolvable:$true] %s25_s12 }
   0x4   :  { %s292_s13 = scalar_lea.vmem %s17_s10, 32  ;;  %p297_p1 = scmp.lt.s32.totalorder %s17_s10, %s17_s10 }
   0x5   :  { %p293_p0 = scmp.ne.s32.totalorder %s17_s10, %s292_s13  ;;  %p298_p2 = scmp.lt.s32.totalorder %s292_s13, %s292_s13 }
   0x7   :  { %p299_p3 = por %p298_p2, %p297_p1 }
   0x9   :  { %p300_p4 = pnand %p299_p3, %p293_p0 }
   0xb   :  { %303 = shalt.err (!%p300_p4)
}
   0xc   :  { %19 = dma.hbm_to_vmem [thread:$0]  %s437_s0, 32, %s17_s10, [#allocation3]  }
   0xd   :  { %s312_s16 = scalar_lea.vmem %s26_s12, 128  ;;  %p317_p6 = scmp.lt.s32.totalorder %s26_s12, %s26_s12 }
   0xe   :  { %p313_p5 = scmp.ne.s32.totalorder %s26_s12, %s312_s16  ;;  %p318_p7 = scmp.lt.s32.totalorder %s312_s16, %s312_s16 }
  0x10   :  { %p319_p8 = por %p318_p7, %p317_p6 }
  0x12   :  { %p320_p9 = pnand %p319_p8, %p313_p5 }
  0x14   :  { %323 = shalt.err (!%p320_p9)
}
  0x15   :  { %s352_s17 = smov 64   ;;  %s353_s18 = smov 4  }
  0x16   :  { %31 = dma.hbm_to_vmem [thread:$0]  %s438_s1, 128, %s26_s12, [#allocation6], %s352_s17, %s352_s17, %s353_s18  }
  0x17   :  { %344 = dma.done.wait [#allocation3], 32  }
  0x18   :  { %345 = vsyncadd [#allocation3], 4294967264 }
  0x19   :  { %346 = dma.done.wait [#allocation6], 128  }
  0x1a   :  { %347 = vsyncadd [#allocation6], 4294967168  ;;  %v354_v0 = vmov 0   ;;  %v383_v1 = vld [vmem:[#allocation5] sm:$0xf]  ;;  %vm94_vm0 = vcmask 1044484   ;;  %v173_v46 = vlaneseq }
  0x1b   :  { %275 = vset.pattern.permute.xlu1 %v354_v0  ;;  %276 = vset.pattern.permute.xlu0 %v354_v0  ;;  %v385_v2 = vld [vmem:[#allocation5 + $0x4] sm:$0xf]  ;;  %v38_v3 = vld [vmem:[#allocation2] sm:$0x3]  ;;  %v74_v4 = vrot.slane %v383_v1, 6  ;;  %vm83_vm1 = vcmask 1043459  }
  0x1c   :  { %v75_v5 = vrot.slane %v385_v2, 6  ;;  %278 = vrcp.f32 %v38_v3  ;;  %vm97_vm2 = vcmask 61443   ;;  %vm86_vm3 = vcmask 60418   ;;  %s355_s0 = smov 127   ;;  %s357_s1 = smov 1  }
  0x1d   :  { %v390_v6 = vsub.f32 %v383_v1, %v74_v4  ;;  %v124_v13 = vrot.slane %v385_v2, 7  ;;  %vm125_vm4 = vcmask 1042434   ;;  %v356_v16 = vmov 1   ;;  %s359_s21 = smov [#allocation7]  }
  0x1e   :  { %v393_v7 = vsub.f32 %v385_v2, %v75_v5  ;;  %v116_v17 = vrot.slane %v383_v1, 1  ;;  %vm117_vm5 = vcmask 1041409   ;;  %vm122_vm6 = vcmask 7168   ;;  %s250_s22 = sshll.u32 %s359_s21, 4  ;;  %s251_s22 = int_to_ptr.vmem [resolvable:$true] %s250_s22 }
  0x1f   :  { %v126_v15 = vsel %vm125_vm4, %v124_v13, %v383_v1  ;;  %vm130_vm7 = vcmask 56320   ;;  %v358_v44 = vmov 1966171168   ;;  %vm221_vm8 = vcmask 1040384   ;;  %s324_s23 = scalar_lea.vmem %s251_s22, 256  ;;  %p329_p11 = scmp.lt.s32.totalorder %s251_s22, %s251_s22 }
  0x20   :  { %v82_v8 = vrot.slane %v393_v7, 7  ;;  %v118_v18 = vsel %vm117_vm5, %v385_v2, %v116_v17  ;;  %v171_v45 = vunpack.c.l.s4 %v358_v44  ;;  %vm224_vm9 = vcmask 1041408   ;;  %p325_p10 = scmp.ne.s32.totalorder %s251_s22, %s324_s23  ;;  %p330_p12 = scmp.lt.s32.totalorder %s324_s23, %s324_s23 }
  0x21   :  { %v174_v60 = vshrl.u32 %v173_v46, 7  ;;  %vm227_vm11 = vcmask 1042432   ;;  %vm230_vm14 = vcmask 1043456   ;;  %vm233_vm15 = vcmask 1044480  }
  0x22   :  { %v95_v9 = vsel %vm94_vm0, %v82_v8, %v390_v6  ;;  %v84_v10 = vsel %vm83_vm1, %v82_v8, %v390_v6  ;;  %v172_v59 = vunpack.c.0.s8 %v171_v45  ;;  %vm236_vm0 = vcmask 1045504   ;;  %p331_p13 = por %p330_p12, %p329_p11 }
  0x23   :  { %v98_v11 = vsel %vm97_vm2, %v95_v9, 0.0  ;;  %v87_v12 = vsel %vm86_vm3, %v84_v10, 0.0  ;;  %vm239_vm1 = vcmask 1046528   ;;  %vm242_vm2 = vcmask 64512  }
  0x24   :  { %99 = vadd.xlane.f32.xlu0 %v98_v11  ;;  %v175_v10 = vsub.s32 %v172_v59, %v174_v60  ;;  %p332_p0 = pnand %p331_p13, %p325_p10 }
  0x28   :  { %88 = vadd.xlane.f32.xlu0 %v87_v12 }
  0x29   :  { %v279_v14 = vpop.eup %278 }
  0x2a   :  { %53 = vperm.xlu1 %275, %v279_v14  }
  0x2e   :  { %127 = vrot.lane.b32.xlu1 %v126_v15, %s355_s0 }
  0x2f   :  { %277 = vset.pattern.permute.xlu1 %v356_v16 }
  0x32   :  { %45 = vperm.xlu1 %277, %v279_v14  }
  0x36   :  { %119 = vrot.lane.b32.xlu1 %v118_v18, %s357_s1 }
  0xa5   :  { %v54_v24 = vpop.permute.xlu1 %53 }
  0xa6   :  { %v55_v32 = vrot.slane %v54_v24, 7  ;;  %v59_v34 = vmul.f32 %v54_v24, %v385_v2  ;;  %v66_v47 = vrot.slane %v54_v24, 5  ;;  %v67_v58 = vrot.slane %v54_v24, 6 }
  0xa8   :  { %v149_v38 = vsub.f32 1.0, %v59_v34  ;;  %v58_v42 = vmul.f32 %v55_v32, %v383_v1  ;;  %v70_v61 = vmul.f32 %v66_v47, %v383_v1  ;;  %v71_v9 = vmul.f32 %v67_v58, %v385_v2 }
  0xa9   :  { %v128_v25 = vpop.permute.xlu1 %127 }
  0xaa   :  { %v131_v31 = vsel %vm130_vm7, %v128_v25, 0.0  ;;  %v148_v52 = vsub.f32 1.0, %v58_v42  ;;  %v152_v53 = vrot.slane %v149_v38, 7 }
  0xab   :  { %v145_v35 = vsub.f32 %v131_v31, %v126_v15 }
  0xac   :  { %v153_v0 = vsel %vm125_vm4, %v152_v53, %v148_v52 }
  0xad   :  { %v100_v19 = vpop.xlane.xlu0 %99  ;;  %v46_v28 = vpop.permute.xlu1 %45  ;;  %v146_v48 = vmul.f32 %v145_v35, %v55_v32 }
  0xae   :  { %v101_v20 = vmul.f32 0.125, %v100_v19  ;;  %v47_v36 = vrot.slane %v46_v28, 1  ;;  %v60_v37 = vrot.slane %v46_v28, 6  ;;  %v50_v39 = vmul.f32 %v46_v28, %v383_v1 }
  0xaf   :  { %v61_v49 = vrot.slane %v46_v28, 7  ;;  %vm147_vm10 = vcmp.lt.f32.partialorder %v146_v48, -0.2 }
  0xb0   :  { %280 = vrcp.f32 %v101_v20  ;;  %v51_v50 = vmul.f32 %v47_v36, %v385_v2  ;;  %v64_v51 = vmul.f32 %v60_v37, %v383_v1  ;;  %v222_v57 = vsel %vm221_vm8, %v50_v39, %v58_v42 }
  0xb1   :  { %v89_v26 = vpop.xlane.xlu0 %88  ;;  %v120_v29 = vpop.permute.xlu1 %119  ;;  %v65_v62 = vmul.f32 %v61_v49, %v385_v2  ;;  %v155_v12 = vsel %vm147_vm10, %v153_v0, %v146_v48 }
  0xb2   :  { %v91_v27 = vmul.f32 0.125, %v89_v26  ;;  %v123_v30 = vsel %vm122_vm6, 0.0, %v120_v29  ;;  %v225_v4 = vsel %vm224_vm9, %v222_v57, %v64_v51  ;;  %v213_v26 = vsub.s32 0, %v174_v60 }
  0xb3   :  { %v133_v33 = vrot.slane %v123_v30, 7  ;;  %v137_v41 = vsub.f32 %v385_v2, %v123_v30  ;;  %v228_v14 = vsel %vm227_vm11, %v225_v4, %v70_v61 }
  0xb4   :  { %282 = vrcp.f32 %v91_v27 }
  0xb5   :  { %v136_v40 = vsub.f32 %v383_v1, %v133_v33  ;;  %v139_v56 = vmul.f32 %v137_v41, %v54_v24 }
  0xb7   :  { %v138_v55 = vmul.f32 %v136_v40, %v55_v32  ;;  %vm141_vm13 = vcmp.lt.f32.partialorder %v139_v56, -0.2 }
  0xb8   :  { %v143_v17 = vsel %vm141_vm13, %v59_v34, %v139_v56 }
  0xb9   :  { %vm140_vm12 = vcmp.lt.f32.partialorder %v138_v55, -0.2 }
  0xba   :  { %v142_v16 = vsel %vm140_vm12, %v58_v42, %v138_v55 }
  0xbd   :  { %v403_v21 = vpop.eup %280 }
  0xbe   :  { %v156_v22 = vrot.slane %v403_v21, 3  ;;  %v111_v1 = vrot.slane %v403_v21, 1  ;;  %v114_v19 = vmul.f32 %v403_v21, %v390_v6 }
  0xc0   :  { %v158_v23 = vmul.f32 %v156_v22, %v38_v3  ;;  %v223_v3 = vsel %vm221_vm8, %v51_v50, %v59_v34  ;;  %v201_v30 = vrot.slane %v114_v19, 6 }
  0xc1   :  { %v283_v43 = vpop.eup %282  ;;  %v226_v13 = vsel %vm224_vm9, %v223_v3, %v65_v62 }
  0xc2   :  { %161 = vperm.xlu0 %276, %v158_v23   ;;  %v105_v54 = vrot.slane %v283_v43, 1  ;;  %v108_v63 = vmul.f32 %v283_v43, %v390_v6  ;;  %v115_v23 = vmul.f32 %v111_v1, %v393_v7  ;;  %v229_v25 = vsel %vm227_vm11, %v226_v13, %v71_v9 }
  0xc4   :  { %v109_v5 = vmul.f32 %v105_v54, %v393_v7  ;;  %v195_v15 = vrot.slane %v108_v63, 6  ;;  %v202_v6 = vrot.slane %v115_v23, 6 }
  0xc6   :  { %v196_v20 = vrot.slane %v109_v5, 6  ;;  %v231_v29 = vsel %vm230_vm14, %v228_v14, %v195_v15 }
  0xc7   :  { %v234_v34 = vsel %vm233_vm15, %v231_v29, %v201_v30 }
  0xc8   :  { %v232_v33 = vsel %vm230_vm14, %v229_v25, %v196_v20 }
  0xc9   :  { %v235_v37 = vsel %vm233_vm15, %v232_v33, %v202_v6 }
 0x13d   :  { %v162_v8 = vpop.permute.xlu0 %161 }
 0x13e   :  { %v163_v11 = vrot.slane %v162_v8, 7  ;;  %v167_v22 = vmul.f32 %v162_v8, %v143_v17 }
 0x140   :  { %v168_v18 = vmul.f32 %v163_v11, %v155_v12  ;;  %v166_v2 = vmul.f32 %v163_v11, %v142_v16  ;;  %v208_v32 = vrot.slane %v167_v22, 3 }
 0x142   :  { %v176_v24 = vrot.slane %v168_v18, %v175_v10  ;;  %v207_v31 = vrot.slane %v166_v2, 3  ;;  %v238_v39 = vsel %vm236_vm0, %v235_v37, %v208_v32 }
 0x144   :  { %v177_v27 = vcombine.high %v176_v24, %v176_v24  ;;  %v184_v28 = vrot.slane %v176_v24, %v175_v10  ;;  %v237_v38 = vsel %vm236_vm0, %v234_v34, %v207_v31 }
 0x146   :  { %v191_v21 = vrot.slane %v177_v27, %v175_v10  ;;  %v192_v7 = vcombine.high %v184_v28, %v184_v28 }
 0x148   :  { %v214_v35 = vrot.slane %v191_v21, %v213_v26  ;;  %v218_v36 = vrot.slane %v192_v7, %v213_v26 }
 0x14a   :  { %v240_v40 = vsel %vm239_vm1, %v237_v38, %v214_v35  ;;  %v241_v41 = vsel %vm239_vm1, %v238_v39, %v218_v36 }
 0x14b   :  { %243 = vst.msk [vmem:[#allocation7] sm:$0xff] %vm242_vm2, %v240_v40  ;;  %244 = vst.msk [vmem:[#allocation7 + $0x8] sm:$0xff] %vm242_vm2, %v241_v41 }
 0x14c   :  { %335 = shalt.err (!%p332_p0)
}
 0x14d   :  { %s360_s24 = smov 128   ;;  %s361_s25 = smov 8  }
 0x14e   :  { %256 = dma.vmem_to_hbm [thread:$0]  %s251_s22, 256, %s439_s2, [#allocation4], %s360_s24, %s360_s24, %s361_s25  }
 0x14f   :  { %348 = dma.done.wait [#allocation4], 256  }
 0x150   :  { %349 = vsyncadd [#allocation4], 4294967040 }
 0x151   :  { %260 = vsyncpa [#allocation3], 1 }
 0x152   :  { %261 = vsyncpa [#allocation6], 1 }
 0x153   :  { %262 = vsyncpa [#allocation4], 1 }

</bundles_post_ra>
